<compile_context>
chip_gen: v7x
topology: tpu7x:2x2x1
jax: 0.10.0
libtpu: 0.0.40
codegen_flags: <defaults>
</compile_context>

<pallas_src>
import functools
import math

import jax
import jax.numpy as jnp
from jax.experimental import pallas as pl
from jax.experimental.pallas import tpu as pltpu


# ----------------------------- kernels -------------------------------------- #

def gcn_layer1_kernel(a_ref, w1_ref, b1_ref, h_ref):
    """h_tile = relu( sum_i A_i[tile, :] @ W1_i + b1 ).

    a_ref : (S, TM, N)  bf16  adjacency row slab (streamed)
    w1_ref: (S, N, HP)  bf16  resident
    b1_ref: (1, HP)     f32   resident
    h_ref : (TM, HP)    bf16  output tile
    """
    s = a_ref.shape[0]
    acc = jnp.zeros(h_ref.shape, jnp.float32)
    for i in range(s):  # S is tiny and static — unrolled
        acc += jnp.dot(a_ref[i], w1_ref[i], preferred_element_type=jnp.float32)
    h = jnp.maximum(acc + b1_ref[...], 0.0)
    h_ref[...] = h.astype(h_ref.dtype)


def gcn_layer2_kernel(a_ref, h_ref, w2_ref, b2_ref, o_ref):
    """out_tile = sigmoid( sum_i (A_i[tile, :] @ h) @ W2_i + b2 ).

    a_ref : (S, TM, N)   bf16  adjacency row slab (streamed)
    h_ref : (N, HP)      bf16  resident hidden activations
    w2_ref: (S*HP, CP)   bf16  resident, W2_i stacked along rows, lane-padded
    b2_ref: (1, 1)       f32   SMEM scalar (GCN hardcodes output_dim = 1)
    o_ref : (TM, CP)     f32   lane-dense padded output tile
    """
    s = a_ref.shape[0]
    hp = h_ref.shape[-1]
    acc = jnp.zeros(o_ref.shape, jnp.float32)
    for i in range(s):
        # Lane-dense: (TM, N) @ (N, HP) -> 256-lane output, f32 accumulation.
        g = jnp.dot(a_ref[i], h_ref[...], preferred_element_type=jnp.float32)
        # Reduce with K = HP = 256 (clean MXU passes), static row slice of W2.
        acc += jnp.dot(g.astype(w2_ref.dtype), w2_ref[i * hp:(i + 1) * hp, :],
                       preferred_element_type=jnp.float32)
    o_ref[...] = jax.nn.sigmoid(acc + b2_ref[0, 0])


# ----------------------------- wrapper --------------------------------------- #

def _round_up(x, m):
    return ((x + m - 1) // m) * m


def _pick_tile_m(n):
    """Largest row tile (multiple of 8, <=512) that divides N with >=2 steps."""
    for tm in (512, 256, 128, 64, 32, 16, 8):
        if tm < n and n % tm == 0:
            return tm
    return n


def prepare_inputs(supports, params):
    """One-time layout prep, hoisted out of the per-forward path."""
    s, n, _ = supports.shape
    hd = params["W1"].shape[-1]
    c = params["W2"].shape[-1]
    assert c == 1, "GCN hardcodes output_dim=1 (scalar SMEM bias relies on it)"
    hp = _round_up(hd, 128)              # 200 -> 256
    cp = _round_up(max(c, 128), 128)     # 1   -> 128 (lane-dense output)

    a = supports.astype(jnp.bfloat16)                                       # (S, N, N)
    w1 = jnp.pad(params["W1"], ((0, 0), (0, 0), (0, hp - hd))
                 ).astype(jnp.bfloat16)                                     # (S, N, HP)
    b1 = jnp.pad(params["b1"], ((0, 0), (0, hp - hd))).astype(jnp.float32)  # (1, HP)
    w2 = jnp.pad(params["W2"], ((0, 0), (0, hp - hd), (0, cp - c))
                 ).reshape(s * hp, cp).astype(jnp.bfloat16)                 # (S*HP, CP)
    b2 = params["b2"].reshape(1, -1)[:, :1].astype(jnp.float32)             # (1, 1)
    return a, w1, b1, w2, b2, c


@functools.partial(jax.jit, static_argnames=("out_dim",))
def gcn_forward(a, w1, b1, w2, b2, *, out_dim):
    # NOTE: x is never used in the forward: layer1 is featureless and
    # dropout_rate == 0.0 (eval semantics), exactly as in the PyTorch module.
    s, n, _ = a.shape
    hp = w1.shape[-1]
    cp = w2.shape[-1]
    tm = _pick_tile_m(n)
    grid = (n // tm,)

    cparams = pltpu.CompilerParams(
        dimension_semantics=("parallel",),       # shard row tiles across TCs (v7x)
        vmem_limit_bytes=48 * 1024 * 1024,       # safe on v5e/v6e/v7x
    )

    # ---------------- layer 1: h = relu(sum_i A_i @ W1_i + b1) --------------- #
    h = pl.pallas_call(
        gcn_layer1_kernel,
        out_shape=jax.ShapeDtypeStruct((n, hp), jnp.bfloat16),
        grid=grid,
        in_specs=[
            pl.BlockSpec((s, tm, n), lambda i: (0, i, 0)),   # A row slab, streamed
            pl.BlockSpec((s, n, hp), lambda i: (0, 0, 0)),   # W1, resident
            pl.BlockSpec((1, hp), lambda i: (0, 0)),         # b1, resident
        ],
        out_specs=pl.BlockSpec((tm, hp), lambda i: (i, 0)),
        compiler_params=cparams,
        cost_estimate=pl.CostEstimate(
            flops=2 * s * n * n * hp,
            transcendentals=0,
            bytes_accessed=2 * (a.size + w1.size + n * hp) + 4 * b1.size),
    )(a, w1, b1)

    # ------- layer 2: out = sigmoid(sum_i (A_i @ h) @ W2_i + b2) ------------- #
    out_padded = pl.pallas_call(
        gcn_layer2_kernel,
        out_shape=jax.ShapeDtypeStruct((n, cp), jnp.float32),
        grid=grid,
        in_specs=[
            pl.BlockSpec((s, tm, n), lambda i: (0, i, 0)),   # A row slab, streamed
            pl.BlockSpec((n, hp), lambda i: (0, 0)),         # h, resident
            pl.BlockSpec((s * hp, cp), lambda i: (0, 0)),    # W2 stacked, resident
            pl.BlockSpec(memory_space=pltpu.MemorySpace.SMEM),  # (1,1) scalar bias
        ],
        out_specs=pl.BlockSpec((tm, cp), lambda i: (i, 0)),
        compiler_params=cparams,
        cost_estimate=pl.CostEstimate(
            flops=2 * s * n * n * hp + 2 * n * s * hp * cp,
            transcendentals=n * cp,
            bytes_accessed=2 * (a.size + n * hp + w2.size) + 4 * (n * cp) + 4),
    )(a, h, w2, b2)

    return out_padded[:, :out_dim]


# ----------------------------- references ------------------------------------ #

def gcn_reference_prepared(a, w1, b1, w2, b2, out_dim):
    """Pure-JAX reference using the same bf16/f32 mixed precision as the kernel."""
    s, n, _ = a.shape
    hp = w1.shape[-1]
    cp = w2.shape[-1]
    acc = jnp.zeros((n, hp), jnp.float32)
    for i in range(s):
        acc += jnp.dot(a[i], w1[i], preferred_element_type=jnp.float32)
    h = jnp.maximum(acc + b1, 0.0).astype(jnp.bfloat16)
    acc2 = jnp.zeros((n, cp), jnp.float32)
    for i in range(s):
        g = jnp.dot(a[i], h, preferred_element_type=jnp.float32).astype(jnp.bfloat16)
        acc2 += jnp.dot(g, w2[i * hp:(i + 1) * hp, :],
                        preferred_element_type=jnp.float32)
    return jax.nn.sigmoid(acc2 + b2[0, 0])[:, :out_dim]


def gcn_reference_f32(supports, params):
    """Full-f32 reference matching the PyTorch module."""
    s = supports.shape[0]
    acc = sum(supports[i] @ params["W1"][i] for i in range(s))
    h = jax.nn.relu(acc + params["b1"])
    acc2 = sum(supports[i] @ (h @ params["W2"][i]) for i in range(s))
    return jax.nn.sigmoid(acc2 + params["b2"])


# ----------------------------- main ------------------------------------------ #

if __name__ == "__main__":
    key = jax.random.PRNGKey(0)
    N = 64     # number of graph nodes == input_dim (featureless first layer)
    H = 200    # hidden dim hard-coded in GCN.__init__
    C = 1      # output dim of layer2 hard-coded in GCN.__init__
    S = 2      # number of support matrices

    k_a, k_x, k_w1a, k_w1b, k_w2a, k_w2b = jax.random.split(key, 6)

    supports = jax.random.normal(k_a, (S, N, N), jnp.float32) * 0.1
    x = jax.random.normal(k_x, (N, N), jnp.float32)  # unused by the forward pass

    # Parameter init mirroring GraphConvolution.__init__ / reset_parameters:
    #   W0 -> xavier_uniform_(gain=1); Wi (i>0) -> torch.randn; b -> zeros.
    lim1 = math.sqrt(6.0 / (N + H))
    W1 = jnp.stack([
        jax.random.uniform(k_w1a, (N, H), jnp.float32, -lim1, lim1),
        jax.random.normal(k_w1b, (N, H), jnp.float32),
    ])[:S]
    lim2 = math.sqrt(6.0 / (H + C))
    W2 = jnp.stack([
        jax.random.uniform(k_w2a, (H, C), jnp.float32, -lim2, lim2),
        jax.random.normal(k_w2b, (H, C), jnp.float32),
    ])[:S]

    params = {
        "W1": W1, "b1": jnp.zeros((1, H), jnp.float32),
        "W2": W2, "b2": jnp.zeros((1, C), jnp.float32),
    }

    # One-time layout prep (amortised across forwards), then the fused forward.
    a, w1, b1, w2, b2, c = prepare_inputs(supports, params)
    out = jax.block_until_ready(gcn_forward(a, w1, b1, w2, b2, out_dim=c))

    ref_m = jax.block_until_ready(gcn_reference_prepared(a, w1, b1, w2, b2, c))
    ref_f = jax.block_until_ready(gcn_reference_f32(supports, params))

    assert out.shape == (N, C), out.shape
    assert jnp.allclose(out, ref_m, atol=2e-3), float(jnp.max(jnp.abs(out - ref_m)))
    assert jnp.allclose(out, ref_f, atol=8e-2), float(jnp.max(jnp.abs(out - ref_f)))
    print("KERNEL_OK")
</pallas_src>

<mosaic_0001>
module attributes {stable_mosaic.version = 11 : i64} {
  func.func @gcn_layer2_kernel(%arg0: i32, %arg1: memref<2x32x64xbf16, #tpu.memory_space<vmem>>, %arg2: memref<64x256xbf16, #tpu.memory_space<vmem>>, %arg3: memref<512x128xbf16, #tpu.memory_space<vmem>>, %arg4: memref<1x1xf32, #tpu.memory_space<smem>>, %arg5: memref<32x128xf32, #tpu.memory_space<vmem>>) attributes {dimension_semantics = [#tpu.dimension_semantics<parallel>], iteration_bounds = array<i64: 2>, scalar_prefetch = 0 : i64, scratch_operands = 0 : i64, tpu.core_type = #tpu.core_type<tc>, window_params = [{transform_indices = @transform_0, window_bounds = array<i64: 2, 32, 64>}, {pipeline_mode = #tpu.pipeline_mode<synchronous>, transform_indices = @transform_1, window_bounds = array<i64: 64, 256>}, {pipeline_mode = #tpu.pipeline_mode<synchronous>, transform_indices = @transform_2, window_bounds = array<i64: 512, 128>}, {transform_indices = @transform_3, window_bounds = array<i64: 1, 1>}, {transform_indices = @transform_4, window_bounds = array<i64: 32, 128>}]} {
    %cst = arith.constant 0.000000e+00 : f32
    %0 = vector.broadcast %cst : f32 to vector<32x128xf32>
    %c0 = arith.constant 0 : index
    %c0_0 = arith.constant 0 : index
    %c0_1 = arith.constant 0 : index
    %1 = vector.load %arg1[%c0, %c0_0, %c0_1] : memref<2x32x64xbf16, #tpu.memory_space<vmem>>, vector<1x32x64xbf16>
    %2 = vector.shape_cast %1 : vector<1x32x64xbf16> to vector<32x64xbf16>
    %c0_2 = arith.constant 0 : index
    %c0_3 = arith.constant 0 : index
    %3 = vector.load %arg2[%c0_2, %c0_3] : memref<64x256xbf16, #tpu.memory_space<vmem>>, vector<64x256xbf16>
    %cst_4 = arith.constant dense<0.000000e+00> : vector<32x256xf32>
    %4 = tpu.matmul %2, %3, %cst_4 {dimension_numbers = #tpu.dot_dimension_numbers<[1], [0], [0], [1], [0, 0, 1, 1], [], []>} : vector<32x64xbf16>, vector<64x256xbf16>, vector<32x256xf32> -> vector<32x256xf32>
    %5 = arith.truncf %4 : vector<32x256xf32> to vector<32x256xbf16>
    %c0_5 = arith.constant 0 : index
    %c0_6 = arith.constant 0 : index
    %6 = vector.load %arg3[%c0_5, %c0_6] : memref<512x128xbf16, #tpu.memory_space<vmem>>, vector<256x128xbf16>
    %cst_7 = arith.constant dense<0.000000e+00> : vector<32x128xf32>
    %7 = tpu.matmul %5, %6, %cst_7 {dimension_numbers = #tpu.dot_dimension_numbers<[1], [0], [0], [1], [0, 0, 1, 1], [], []>} : vector<32x256xbf16>, vector<256x128xbf16>, vector<32x128xf32> -> vector<32x128xf32>
    %8 = arith.addf %0, %7 : vector<32x128xf32>
    %c1 = arith.constant 1 : index
    %c0_8 = arith.constant 0 : index
    %c0_9 = arith.constant 0 : index
    %9 = vector.load %arg1[%c1, %c0_8, %c0_9] : memref<2x32x64xbf16, #tpu.memory_space<vmem>>, vector<1x32x64xbf16>
    %10 = vector.shape_cast %9 : vector<1x32x64xbf16> to vector<32x64xbf16>
    %c0_10 = arith.constant 0 : index
    %c0_11 = arith.constant 0 : index
    %11 = vector.load %arg2[%c0_10, %c0_11] : memref<64x256xbf16, #tpu.memory_space<vmem>>, vector<64x256xbf16>
    %cst_12 = arith.constant dense<0.000000e+00> : vector<32x256xf32>
    %12 = tpu.matmul %10, %11, %cst_12 {dimension_numbers = #tpu.dot_dimension_numbers<[1], [0], [0], [1], [0, 0, 1, 1], [], []>} : vector<32x64xbf16>, vector<64x256xbf16>, vector<32x256xf32> -> vector<32x256xf32>
    %13 = arith.truncf %12 : vector<32x256xf32> to vector<32x256xbf16>
    %c256 = arith.constant 256 : index
    %c0_13 = arith.constant 0 : index
    %14 = vector.load %arg3[%c256, %c0_13] : memref<512x128xbf16, #tpu.memory_space<vmem>>, vector<256x128xbf16>
    %cst_14 = arith.constant dense<0.000000e+00> : vector<32x128xf32>
    %15 = tpu.matmul %13, %14, %cst_14 {dimension_numbers = #tpu.dot_dimension_numbers<[1], [0], [0], [1], [0, 0, 1, 1], [], []>} : vector<32x256xbf16>, vector<256x128xbf16>, vector<32x128xf32> -> vector<32x128xf32>
    %16 = arith.addf %8, %15 : vector<32x128xf32>
    %c0_15 = arith.constant 0 : index
    %c0_16 = arith.constant 0 : index
    %17 = memref.load %arg4[%c0_15, %c0_16] : memref<1x1xf32, #tpu.memory_space<smem>>
    %18 = vector.broadcast %17 : f32 to vector<32x128xf32>
    %19 = arith.addf %16, %18 : vector<32x128xf32>
    %20 = arith.negf %19 : vector<32x128xf32>
    %21 = math.exp %20 : vector<32x128xf32>
    %cst_17 = arith.constant 1.000000e+00 : f32
    %22 = vector.broadcast %cst_17 : f32 to vector<32x128xf32>
    %23 = arith.addf %22, %21 : vector<32x128xf32>
    %24 = arith.divf %22, %23 : vector<32x128xf32>
    %c0_18 = arith.constant 0 : index
    %c0_19 = arith.constant 0 : index
    %25 = vector.load %arg5[%c0_18, %c0_19] : memref<32x128xf32, #tpu.memory_space<vmem>>, vector<32x128xf32>
    tpu.vector_store %arg5[%c0_18, %c0_19], %24 {strides = array<i32>} : memref<32x128xf32, #tpu.memory_space<vmem>>, vector<32x128xf32>,
    return
  }
  func.func @transform_0(%arg0: i32) -> (i32, i32, i32) {
    %c0_i32 = arith.constant 0 : i32
    %c0_i32_0 = arith.constant 0 : i32
    %c0_i32_1 = arith.constant 0 : i32
    return %c0_i32, %arg0, %c0_i32_0 : i32, i32, i32
  }
  func.func @transform_1(%arg0: i32) -> (i32, i32) {
    %c0_i32 = arith.constant 0 : i32
    %c0_i32_0 = arith.constant 0 : i32
    %c0_i32_1 = arith.constant 0 : i32
    return %c0_i32, %c0_i32_0 : i32, i32
  }
  func.func @transform_2(%arg0: i32) -> (i32, i32) {
    %c0_i32 = arith.constant 0 : i32
    %c0_i32_0 = arith.constant 0 : i32
    %c0_i32_1 = arith.constant 0 : i32
    return %c0_i32, %c0_i32_0 : i32, i32
  }
  func.func @transform_3(%arg0: i32) -> (i32, i32) {
    %c0_i32 = arith.constant 0 : i32
    %c0_i32_0 = arith.constant 0 : i32
    %c0_i32_1 = arith.constant 0 : i32
    return %c0_i32, %c0_i32_0 : i32, i32
  }
  func.func @transform_4(%arg0: i32) -> (i32, i32) {
    %c0_i32 = arith.constant 0 : i32
    %c0_i32_0 = arith.constant 0 : i32
    return %arg0, %c0_i32 : i32, i32
  }
}

module attributes {stable_mosaic.version = 11 : i64} {
  func.func @gcn_layer1_kernel(%arg0: i32, %arg1: memref<2x32x64xbf16, #tpu.memory_space<vmem>>, %arg2: memref<2x64x256xbf16, #tpu.memory_space<vmem>>, %arg3: memref<1x256xf32, #tpu.memory_space<vmem>>, %arg4: memref<32x256xbf16, #tpu.memory_space<vmem>>) attributes {dimension_semantics = [#tpu.dimension_semantics<parallel>], iteration_bounds = array<i64: 2>, scalar_prefetch = 0 : i64, scratch_operands = 0 : i64, tpu.core_type = #tpu.core_type<tc>, window_params = [{transform_indices = @transform_0, window_bounds = array<i64: 2, 32, 64>}, {pipeline_mode = #tpu.pipeline_mode<synchronous>, transform_indices = @transform_1, window_bounds = array<i64: 2, 64, 256>}, {pipeline_mode = #tpu.pipeline_mode<synchronous>, transform_indices = @transform_2, window_bounds = array<i64: 1, 256>}, {transform_indices = @transform_3, window_bounds = array<i64: 32, 256>}]} {
    %cst = arith.constant 0.000000e+00 : f32
    %0 = vector.broadcast %cst : f32 to vector<32x256xf32>
    %c0 = arith.constant 0 : index
    %c0_0 = arith.constant 0 : index
    %c0_1 = arith.constant 0 : index
    %1 = vector.load %arg1[%c0, %c0_0, %c0_1] : memref<2x32x64xbf16, #tpu.memory_space<vmem>>, vector<1x32x64xbf16>
    %2 = vector.shape_cast %1 : vector<1x32x64xbf16> to vector<32x64xbf16>
    %c0_2 = arith.constant 0 : index
    %c0_3 = arith.constant 0 : index
    %c0_4 = arith.constant 0 : index
    %3 = vector.load %arg2[%c0_2, %c0_3, %c0_4] : memref<2x64x256xbf16, #tpu.memory_space<vmem>>, vector<1x64x256xbf16>
    %4 = vector.shape_cast %3 : vector<1x64x256xbf16> to vector<64x256xbf16>
    %cst_5 = arith.constant dense<0.000000e+00> : vector<32x256xf32>
    %5 = tpu.matmul %2, %4, %cst_5 {dimension_numbers = #tpu.dot_dimension_numbers<[1], [0], [0], [1], [0, 0, 1, 1], [], []>} : vector<32x64xbf16>, vector<64x256xbf16>, vector<32x256xf32> -> vector<32x256xf32>
    %6 = arith.addf %0, %5 : vector<32x256xf32>
    %c1 = arith.constant 1 : index
    %c0_6 = arith.constant 0 : index
    %c0_7 = arith.constant 0 : index
    %7 = vector.load %arg1[%c1, %c0_6, %c0_7] : memref<2x32x64xbf16, #tpu.memory_space<vmem>>, vector<1x32x64xbf16>
    %8 = vector.shape_cast %7 : vector<1x32x64xbf16> to vector<32x64xbf16>
    %c1_8 = arith.constant 1 : index
    %c0_9 = arith.constant 0 : index
    %c0_10 = arith.constant 0 : index
    %9 = vector.load %arg2[%c1_8, %c0_9, %c0_10] : memref<2x64x256xbf16, #tpu.memory_space<vmem>>, vector<1x64x256xbf16>
    %10 = vector.shape_cast %9 : vector<1x64x256xbf16> to vector<64x256xbf16>
    %cst_11 = arith.constant dense<0.000000e+00> : vector<32x256xf32>
    %11 = tpu.matmul %8, %10, %cst_11 {dimension_numbers = #tpu.dot_dimension_numbers<[1], [0], [0], [1], [0, 0, 1, 1], [], []>} : vector<32x64xbf16>, vector<64x256xbf16>, vector<32x256xf32> -> vector<32x256xf32>
    %12 = arith.addf %6, %11 : vector<32x256xf32>
    %c0_12 = arith.constant 0 : index
    %c0_13 = arith.constant 0 : index
    %13 = vector.load %arg3[%c0_12, %c0_13] : memref<1x256xf32, #tpu.memory_space<vmem>>, vector<1x256xf32>
    %14 = vector.broadcast %13 : vector<1x256xf32> to vector<32x256xf32>
    %15 = arith.addf %12, %14 : vector<32x256xf32>
    %cst_14 = arith.constant 0.000000e+00 : f32
    %16 = vector.broadcast %cst_14 : f32 to vector<32x256xf32>
    %17 = arith.maximumf %15, %16 : vector<32x256xf32>
    %18 = arith.truncf %17 : vector<32x256xf32> to vector<32x256xbf16>
    %c0_15 = arith.constant 0 : index
    %c0_16 = arith.constant 0 : index
    %19 = vector.load %arg4[%c0_15, %c0_16] : memref<32x256xbf16, #tpu.memory_space<vmem>>, vector<32x256xbf16>
    tpu.vector_store %arg4[%c0_15, %c0_16], %18 {strides = array<i32>} : memref<32x256xbf16, #tpu.memory_space<vmem>>, vector<32x256xbf16>,
    return
  }
  func.func @transform_0(%arg0: i32) -> (i32, i32, i32) {
    %c0_i32 = arith.constant 0 : i32
    %c0_i32_0 = arith.constant 0 : i32
    %c0_i32_1 = arith.constant 0 : i32
    return %c0_i32, %arg0, %c0_i32_0 : i32, i32, i32
  }
  func.func @transform_1(%arg0: i32) -> (i32, i32, i32) {
    %c0_i32 = arith.constant 0 : i32
    %c0_i32_0 = arith.constant 0 : i32
    %c0_i32_1 = arith.constant 0 : i32
    %c0_i32_2 = arith.constant 0 : i32
    return %c0_i32, %c0_i32_0, %c0_i32_1 : i32, i32, i32
  }
  func.func @transform_2(%arg0: i32) -> (i32, i32) {
    %c0_i32 = arith.constant 0 : i32
    %c0_i32_0 = arith.constant 0 : i32
    %c0_i32_1 = arith.constant 0 : i32
    return %c0_i32, %c0_i32_0 : i32, i32
  }
  func.func @transform_3(%arg0: i32) -> (i32, i32) {
    %c0_i32 = arith.constant 0 : i32
    %c0_i32_0 = arith.constant 0 : i32
    return %arg0, %c0_i32 : i32, i32
  }
}

</mosaic_0001>

<bundles_post_ra>
// kernel: gcn_forward.2
= control target key start
LH: loop header
LB: loop body
LE: loop exit
PB: predicated region body
PF: predicated region fallthrough
CT: control target
= control target key end

     0   :  { %8 = vsyncpa [#allocation3], 0  ;;  %s1095_s0 = inlined_call_operand.hbm [shape: bf16[2,64,64], index: 0, kind: input, shape index: {}]   ;;  %s1096_s1 = inlined_call_operand.hbm [shape: bf16[2,64,256], index: 1, kind: input, shape index: {}]   ;;  %s1097_s2 = inlined_call_operand.hbm [shape: f32[1,256], index: 2, kind: input, shape index: {}]   ;;  %s1098_s3 = inlined_call_operand.vmem [shape: bf16[64,256], index: 3, kind: output, shape index: {}]  }
   0x1   :  { %10 = vsyncpa [#allocation3 + $0x1], 0 }
   0x2   :  { %11 = vsyncpa [#allocation5], 0  ;;  %s927_s12 = smov 0   ;;  %s929_s13 = smov 0  }
   0x3   :  { %s931_s14 = smov 0   ;;  %s933_s15 = smov 0  }
   0x4 LB: > { %s637_s16 = sadd.s32 4294967295, %s895_s15   ;;  %s947_s17 = sadd.s32 1, %s895_s15   ;;  %s895_s15 = sphi %s933_s15, %s1116_s15   ;;  %s891_s14 = sphi %s931_s14, %s1115_s14   ;;  %s887_s13 = sphi %s929_s13, %s1114_s13   ;;  %s883_s12 = sphi %s927_s12, %s1113_s12  }
   0x5   : > { %s21_s18 = ssub.s32 %s895_s15, %s947_s17  ;;  %s24_s19 = sadd.s32 1, %s891_s14 }
   0x6   : > { %p22_p0 = scmp.eq.s32.totalorder %s21_s18, 0  ;;  %p31_p1 = scmp.ne.s32.totalorder %s891_s14, %s887_s13 }
   0x7   : > { %p32_p2 = scmp.eq.s32.totalorder %s895_s15, 0  ;;  %p37_p3 = scmp.ne.s32.totalorder %s887_s13, %s883_s12 }
   0x8   : > { %s957_s20 = scalar_select %p22_p0, %s891_s14, %s24_s19  }
   0x9   : > { %p959_p4 = por %p32_p2, %p31_p1  ;;  %p965_p5 = scmp.eq.s32.totalorder %s637_s16, 0 }
   0xa   : > { %p639_p6 = scmp.ge.s32.totalorder %s895_s15, 1  ;;  %p116_p7 = scmp.lt.s32.totalorder %s895_s15, 3 }
   0xb   : > { %s1104_s21 = scalar_select %p959_p4, 1, 0 }
   0xc   : > { %s1105_s22 = scalar_select %p965_p5, 1, 0 }
   0xd   : > { %p973_p8 = por %p965_p5, %p37_p3  ;;  %p977_p9 = pnand %p639_p6, %p116_p7 }
   0xe   : > { %s897_s25 = smov [#allocation4]   ;;  %s898_s28 = smov [#allocation6]  }
   0xf   : > { %s1106_s23 = scalar_select %p973_p8, 1, 0 }
  0x10   : > { %s1107_s24 = scalar_select %p977_p9, 1, 0 }
  0x11   : > { %s128_s26 = sshll.u32 %s897_s25, 4  ;;  %p720_p10 = pneg %p977_p9  ;;  %s129_s26 = int_to_ptr.vmem [resolvable:$true] %s128_s26 }
  0x12   : > { %s142_s29 = sshll.u32 %s898_s28, 4  ;;  %s801_s5 = scalar_lea.hbm %s1096_s1, 2048  ;;  %s989_s29 = int_to_ptr.vmem [resolvable:$true] %s142_s29 }
  0x13   : > { %p985_p11 = pnand %p720_p10, %p965_p5  ;;  %p802_p12 = scmp.ne.s32.totalorder %s1096_s1, %s801_s5 }
  0x14   : > { %p808_p2 = scmp.lt.u32.totalorder %s801_s5, %s1096_s1 }
  0x15   : > { %p803_p13 = pneg %p985_p11 }
  0x17   : > { %p804_p0 = pnand %p803_p13, %p802_p12 }
  0x19   : > { %p805_p1 = pneg %p804_p0 }
  0x1b   : > { %p810_p3 = pnand %p808_p2, %p805_p1 }
  0x1d   : > { %813 = shalt.err (!%p810_p3)
}
  0x1e   : > { %s814_s10 = scalar_lea.vmem %s129_s26, 2048  ;;  %p822_p5 = scmp.lt.s32.totalorder %s129_s26, %s129_s26 }
  0x1f   : > { %p815_p6 = scmp.ne.s32.totalorder %s129_s26, %s814_s10  ;;  %p823_p8 = scmp.lt.s32.totalorder %s814_s10, %s814_s10 }
  0x21   : > { %p817_p7 = pnand %p815_p6, %p803_p13  ;;  %p824_p9 = por %p823_p8, %p822_p5 }
  0x23   : > { %p818_p10 = pneg %p817_p7 }
  0x25   : > { %p825_p4 = pnand %p824_p9, %p818_p10 }
  0x27   : > { %828 = shalt.err (!%p825_p4)
}
  0x28   : > { %s899_s11 = smov 128   ;;  %s900_s12 = smov 8  }
  0x29   : > { %723 = dma.hbm_to_vmem [thread:$0]  (!%p985_p11), %s1096_s1, 2048, %s129_s26, [#allocation5], %s899_s11, %s899_s11, %s900_s12  }
  0x2a   : > { %s829_s30 = scalar_lea.hbm %s1097_s2, 32 }
  0x2b   : > { %p830_p12 = scmp.ne.s32.totalorder %s1097_s2, %s829_s30  ;;  %p836_p8 = scmp.lt.u32.totalorder %s829_s30, %s1097_s2 }
  0x2d   : > { %p832_p4 = pnand %p830_p12, %p803_p13 }
  0x2f   : > { %p833_p5 = pneg %p832_p4 }
  0x31   : > { %p838_p9 = pnand %p836_p8, %p833_p5 }
  0x33   : > { %841 = shalt.err (!%p838_p9)
}
  0x34   : > { %s842_s26 = scalar_lea.vmem %s989_s29, 32  ;;  %p850_p3 = scmp.lt.s32.totalorder %s989_s29, %s989_s29 }
  0x35   : > { %p843_p0 = scmp.ne.s32.totalorder %s989_s29, %s842_s26  ;;  %p851_p6 = scmp.lt.s32.totalorder %s842_s26, %s842_s26 }
  0x37   : > { %p845_p1 = pnand %p843_p0, %p803_p13  ;;  %p852_p7 = por %p851_p6, %p850_p3 }
  0x39   : > { %p846_p2 = pneg %p845_p1 }
  0x3b   : > { %p853_p10 = pnand %p852_p7, %p846_p2 }
  0x3d   : > { %856 = shalt.err (!%p853_p10)
}
  0x3e   : > { %726 = dma.hbm_to_vmem [thread:$0]  (!%p985_p11), %s1097_s2, 32, %s989_s29, [#allocation5]  }
  0x3f   : > { %p642_p12 = scmp.ge.s32.totalorder %s895_s15, 2 }
  0x41   : > { %149 = sbr.rel (%p642_p12) target bundleno = 86 (0x56), region = 24 }
  0x48   : > { %s153_s10 = sand.u32 1, %s891_s14   ;;  %s689_s12 = sshll.u32 %s895_s15, 8 }
  0x49   : > { %s643_s11 = sshll.u32 %s153_s10, 5  ;;  %p1109_p13 = scmp.ne.s32.totalorder %s1104_s21, 0 }
  0x4a   : > { %s163_s29 = scalar_lea.hbm %s1095_s0, %s689_s12  ;;  %s157_s28 = scalar_lea.vmem [#allocation2], %s643_s11 }
  0x4b   : > { %s707_s27 = scalar_select %p1109_p13, [#allocation0], [#allocation9] }
  0x4c   : > { %s176_s30 = sshll.u32 %s157_s28, 4  ;;  %s901_s4 = smov 512   ;;  %s177_s30 = int_to_ptr.vmem [resolvable:$true] %s176_s30 }
  0x4d   : > { %s168_s25 = sld [smem:[%s707_s27]]   ;;  %s902_s5 = smov 256  }
  0x4e   : > { %708 = sst [smem:[#allocation8]] (%p1109_p13), %s901_s4  ;;  %s903_s6 = smov 4  }
  0x4f   : > { %709 = sst [smem:[#allocation8 + $0x1]] (%p1109_p13), %s902_s5  ;;  %s904_s7 = smov 64  }
  0x50   : > { %710 = sst [smem:[#allocation8 + $0x2]] (%p1109_p13), %s903_s6  ;;  %s154_s9 = scalar_lea.sflag [#allocation3], %s153_s10 }
  0x51   : > { %711 = sst [smem:[#allocation8 + $0x3]] (%p1109_p13), %s904_s7  ;;  %s905_s11 = smov [#allocation7]  }
  0x52   : > { %712 = sst [smem:[#allocation8 + $0x4]] (%p1109_p13), %s904_s7 }
  0x53   : > { %s646_s26 = sshll.u32 %s168_s25, 26  ;;  %713 = sst [smem:[#allocation8 + $0x5]] (%p1109_p13), %s903_s6 }
  0x54   : > { %s647_s8 = sadd.s32 134217728, %s646_s26 }
  0x55   : > { %714 = dma.general (%p1109_p13), %s163_s29, 512, %s177_s30, %s154_s9, %s905_s11, [#allocation8], %s647_s8, 0  }
  0x56 PF: > { %p1110_p11 = scmp.ne.s32.totalorder %s1107_s24, 0 }
  0x57   : > { %s203_s12 = sand.u32 (!%p1110_p11), 1, %s887_s13   ;;  %p1111_p4 = scmp.ne.s32.totalorder (!%p1110_p11), %s1106_s23, 0 }
  0x58   : > { %201 = sbr.rel (%p1110_p11) target bundleno = 349 (0x15d), region = 32  ;;  %s649_s27 = sshll.u32 (!%p1110_p11), %s203_s12, 5 }
  0x59   : > { %s204_s18 = scalar_lea.sflag (!%p1110_p11), [#allocation3], %s203_s12  ;;  %s1063_s19 = scalar_lea.vmem (!%p1110_p11), [#allocation2], %s649_s27 }
  0x5f   : > { %874 = dma.done.wait (%p1111_p4), %s204_s18, 512  }
  0x60   : > { %876 = vsyncadd (%p1111_p4), %s204_s18, 4294966784  ;;  %p1112_p5 = scmp.ne.s32.totalorder %s1105_s22, 0 }
  0x62   : > { %878 = dma.done.wait (%p1112_p5), [#allocation5], 2080  }
  0x63   : > { %880 = vsyncadd (%p1112_p5), [#allocation5], 4294965216  ;;  %v906_v0 = vmov 0   ;;  %v773_v1 = vld [vmem:[#allocation4 + $0x44] ss:$8 sps:$4 sm:$0xff]   ;;  %v797_v17 = vld [vmem:[%s1063_s19 + $0x10] sm:$0xff]   ;;  %v495_v21 = vlaneseq }
  0x64   : > { %363 = vmatprep.mubr.bf16.mxu1 %v906_v0  ;;  %472 = vmatprep.mubr.bf16.mxu0 %v906_v0  ;;  %v775_v2 = vld [vmem:[#allocation4 + $0x4] ss:$8 sps:$4 sm:$0xff]   ;;  %v777_v3 = vld [vmem:[#allocation4 + $0x40] ss:$8 sps:$4 sm:$0xff]   ;;  %v779_v5 = vld [vmem:[#allocation4 + $0x54] ss:$8 sps:$4 sm:$0xff]  }
  0x65   : > { %331 = vmatprep.subr.bf16.mxu1 %v773_v1  ;;  %v778_v4 = vld [vmem:[#allocation4] ss:$8 sps:$4 sm:$0xff]   ;;  %440 = vmatprep.subr.bf16.mxu0 %v775_v2  ;;  %v781_v6 = vld [vmem:[#allocation4 + $0x14] ss:$8 sps:$4 sm:$0xff]   ;;  %v783_v7 = vld [vmem:[#allocation4 + $0x50] ss:$8 sps:$4 sm:$0xff]  }
  0x66   : > { %332 = vmatpush1.bf16.msra.mxu1 %v777_v3  ;;  %441 = vmatpush1.bf16.msra.mxu0 %v778_v4  ;;  %v784_v8 = vld [vmem:[#allocation4 + $0x10] ss:$8 sps:$4 sm:$0xff]   ;;  %v785_v9 = vld [vmem:[#allocation4 + $0x64] ss:$8 sps:$4 sm:$0xff]   ;;  %v789_v11 = vld [vmem:[#allocation4 + $0x60] ss:$8 sps:$4 sm:$0xff]  }
  0x67   : > { %333 = vmatprep.subr.bf16.mxu1 %v779_v5  ;;  %442 = vmatprep.subr.bf16.mxu0 %v781_v6  ;;  %v787_v10 = vld [vmem:[#allocation4 + $0x24] ss:$8 sps:$4 sm:$0xff]   ;;  %v790_v12 = vld [vmem:[#allocation4 + $0x20] ss:$8 sps:$4 sm:$0xff]   ;;  %v791_v13 = vld [vmem:[#allocation4 + $0x74] ss:$8 sps:$4 sm:$0xff]  }
  0x68   : > { %v793_v14 = vld [vmem:[#allocation4 + $0x34] ss:$8 sps:$4 sm:$0xff]   ;;  %v795_v15 = vld [vmem:[#allocation4 + $0x70] ss:$8 sps:$4 sm:$0xff]   ;;  %v798_v18 = vld [vmem:[%s1063_s19] sm:$0xff]   ;;  %vm324_vm0 = vcmask 523264  }
  0x69   : > { %v796_v16 = vld [vmem:[#allocation4 + $0x30] ss:$8 sps:$4 sm:$0xff]   ;;  %v800_v20 = vld [vmem:[%s1063_s19 + $0x8] sm:$0xff]   ;;  %v496_v22 = vshrl.u32 %v495_v21, 7  ;;  %s652_s21 = sshll.u32 %s637_s16, 2 }
  0x6a   : > { %334 = vmatpush1.bf16.msra.mxu1 %v783_v7  ;;  %443 = vmatpush1.bf16.msra.mxu0 %v784_v8  ;;  %v799_v19 = vld [vmem:[%s1063_s19 + $0x18] sm:$0xff]   ;;  %v493_v24 = vld [vmem:[#allocation6] sm:$0x3]  ;;  %p241_p8 = scmp.lt.s32.totalorder %s652_s21, 7 }
  0x6b   : > { %335 = vmatprep.subr.bf16.mxu1 %v785_v9  ;;  %444 = vmatprep.subr.bf16.mxu0 %v787_v10  ;;  %v497_v23 = vsub.s32 0, %v496_v22  ;;  %v501_v25 = vsub.s32 1, %v496_v22 }
  0x6c   : > { %s1118_s21 = smov (!%p241_p8, %s652_s21), 7 }
  0x6d   : > { %v498_v26 = vrot.slane %v493_v24, %v497_v23  ;;  %v502_v29 = vrot.slane %v493_v24, %v501_v25  ;;  %s690_s15 = sshll.u32 %s1118_s21, 3 }
  0x6e   : > { %336 = vmatpush1.bf16.msra.mxu1 %v789_v11  ;;  %445 = vmatpush1.bf16.msra.mxu0 %v790_v12  ;;  %s245_s23 = scalar_lea.vmem %s1098_s3, %s690_s15 }
  0x6f   : > { %337 = vmatprep.subr.bf16.mxu1 %v791_v13  ;;  %446 = vmatprep.subr.bf16.mxu0 %v793_v14 }
  0x72   : > { %338 = vmatpush1.bf16.msra.mxu1 %v795_v15  ;;  %447 = vmatpush1.bf16.msra.mxu0 %v796_v16 }
  0x75   : > { %669 = vmatmul.mubr.msk.bf16.vlgmr.msra.gmra.mrb[0].mxu1 %vm324_vm0, %v797_v17  ;;  %681 = vmatmul.mubr.msk.bf16.vlgmr.msra.gmra.mrb[0].mxu0 %vm324_vm0, %v798_v18 }
  0x76   : > { %373 = vmatprep.mubr.bf16.mxu1 %v906_v0  ;;  %482 = vmatprep.mubr.bf16.mxu0 %v906_v0 }
  0x7d   : > { %670 = vmatmul.mubr.msk.bf16.gmra.mrb[4].mxu1 %vm324_vm0, %v799_v19  ;;  %682 = vmatmul.mubr.msk.bf16.gmra.mrb[4].mxu0 %vm324_vm0, %v800_v20 }
 0x148   : > { %v365_v27 = vpop.f32.mrb[0].mxu1  ;;  %v474_v28 = vpop.f32.mrb[0].mxu0 }
 0x149   : > { %v475_v30 = vadd.f32 %v474_v28, %v365_v27  ;;  %v367_v31 = vpop.f32.mrb[1].mxu1  ;;  %v476_v32 = vpop.f32.mrb[1].mxu0 }
 0x14a   : > { %v477_v33 = vadd.f32 %v476_v32, %v367_v31  ;;  %v369_v34 = vpop.f32.mrb[2].mxu1  ;;  %v478_v35 = vpop.f32.mrb[2].mxu0 }
 0x14b   : > { %v505_v36 = vadd.f32 %v498_v26, %v475_v30  ;;  %v479_v37 = vadd.f32 %v478_v35, %v369_v34  ;;  %v371_v38 = vpop.f32.mrb[3].mxu1  ;;  %v480_v39 = vpop.f32.mrb[3].mxu0 }
 0x14c   : > { %v506_v40 = vadd.f32 %v502_v29, %v477_v33  ;;  %v481_v41 = vadd.f32 %v480_v39, %v371_v38 }
 0x14d   : > { %v513_v42 = vmax.f32 %v505_v36, 0.0  ;;  %v507_v43 = vadd.f32 %v498_v26, %v479_v37 }
 0x14e   : > { %v514_v44 = vmax.f32 %v506_v40, 0.0  ;;  %v508_v45 = vadd.f32 %v502_v29, %v481_v41 }
 0x14f   : > { %v515_v46 = vmax.f32 %v507_v43, 0.0 }
 0x150   : > { %v691_v47 = vpack.c.bf16 %v514_v44, %v513_v42  ;;  %v516_v48 = vmax.f32 %v508_v45, 0.0  ;;  %v375_v49 = vpop.f32.mrb[4].mxu1  ;;  %v484_v50 = vpop.f32.mrb[4].mxu0 }
 0x151   : > { %v485_v51 = vadd.f32 %v484_v50, %v375_v49  ;;  %v377_v52 = vpop.f32.mrb[5].mxu1  ;;  %v486_v53 = vpop.f32.mrb[5].mxu0 }
 0x152   : > { %545 = vst [vmem:[%s245_s23] sm:$0xff] %v691_v47  ;;  %v692_v54 = vpack.c.bf16 %v516_v48, %v515_v46  ;;  %v487_v55 = vadd.f32 %v486_v53, %v377_v52  ;;  %v379_v56 = vpop.f32.mrb[6].mxu1  ;;  %v488_v57 = vpop.f32.mrb[6].mxu0 }
 0x153   : > { %v509_v58 = vadd.f32 %v498_v26, %v485_v51  ;;  %v489_v59 = vadd.f32 %v488_v57, %v379_v56  ;;  %v381_v60 = vpop.f32.mrb[7].mxu1  ;;  %v490_v61 = vpop.f32.mrb[7].mxu0 }
 0x154   : > { %546 = vst [vmem:[%s245_s23 + $0x8] sm:$0xff] %v692_v54  ;;  %v510_v62 = vadd.f32 %v502_v29, %v487_v55  ;;  %v491_v63 = vadd.f32 %v490_v61, %v381_v60 }
 0x155   : > { %v517_v0 = vmax.f32 %v509_v58, 0.0  ;;  %v511_v1 = vadd.f32 %v498_v26, %v489_v59 }
 0x156   : > { %v518_v2 = vmax.f32 %v510_v62, 0.0  ;;  %v512_v3 = vadd.f32 %v502_v29, %v491_v63 }
 0x157   : > { %v519_v4 = vmax.f32 %v511_v1, 0.0 }
 0x158   : > { %v693_v5 = vpack.c.bf16 %v518_v2, %v517_v0  ;;  %v520_v6 = vmax.f32 %v512_v3, 0.0 }
 0x15a   : > { %547 = vst [vmem:[%s245_s23 + $0x10] sm:$0xff] %v693_v5  ;;  %v694_v7 = vpack.c.bf16 %v520_v6, %v519_v4 }
 0x15c   : > { %548 = vst [vmem:[%s245_s23 + $0x18] sm:$0xff] %v694_v7 }
 0x15d PF: > { %p14_p9 = scmp.ge.s32.totalorder %s947_s17, 4   ;;  %s1113_s12 = smov %s887_s13 }
 0x15e   : > { %s1114_s13 = smov %s891_s14  ;;  %s1115_s14 = smov %s957_s20 }
 0x15f   : > { %s1116_s15 = smov %s947_s17  ;;  %16 = sbr.rel (!%p14_p9) target bundleno = 4 (0x4), region = 87 }
 0x166   :  { %573 = vsyncpa [#allocation3], 1 }
 0x167   :  { %575 = vsyncpa [#allocation3 + $0x1], 1 }
 0x168   :  { %576 = vsyncpa [#allocation5], 1 }

// kernel: gcn_forward.3
= control target key start
LH: loop header
LB: loop body
LE: loop exit
PB: predicated region body
PF: predicated region fallthrough
CT: control target
= control target key end

     0   :  { %s1434_s0 = inlined_call_operand.hbm [shape: bf16[2,64,64], index: 0, kind: input, shape index: {}]   ;;  %s1435_s1 = inlined_call_operand.vmem [shape: bf16[64,256], index: 1, kind: input, shape index: {}]   ;;  %s1436_s2 = inlined_call_operand.vmem [shape: bf16[512,128], index: 2, kind: input, shape index: {}]   ;;  %s1437_s3 = inlined_call_operand.<no memory space> [shape: f32[1,1], index: 3, kind: input, shape index: {}]   ;;  %s1438_s4 = inlined_call_operand.vmem [shape: f32[64,128], index: 4, kind: output, shape index: {}]  }
   0x1   :  { %9 = sst [smem:[#allocation2]] %s1437_s3 }
   0x2   :  { %10 = vsyncpa [#allocation4], 0 }
   0x3   :  { %12 = vsyncpa [#allocation4 + $0x1], 0  ;;  %s1215_s17 = smov 0   ;;  %s1217_s18 = smov 0  }
   0x4   :  { %s1219_s19 = smov 0   ;;  %s1221_s20 = smov 0  }
   0x5 LB: > { %s906_s3 = sadd.s32 4294967295, %s1179_s20   ;;  %s1235_s21 = sadd.s32 1, %s1179_s20   ;;  %s1179_s20 = sphi %s1221_s20, %s1444_s20   ;;  %s1175_s19 = sphi %s1219_s19, %s1443_s19   ;;  %s1171_s18 = sphi %s1217_s18, %s1442_s18   ;;  %s1167_s17 = sphi %s1215_s17, %s1441_s17  }
   0x6   : > { %s22_s22 = ssub.s32 %s1179_s20, %s1235_s21  ;;  %s25_s23 = sadd.s32 1, %s1175_s19 }
   0x7   : > { %p23_p0 = scmp.eq.s32.totalorder %s22_s22, 0  ;;  %p32_p1 = scmp.ne.s32.totalorder %s1175_s19, %s1171_s18 }
   0x8   : > { %p33_p2 = scmp.eq.s32.totalorder %s1179_s20, 0  ;;  %p38_p3 = scmp.ne.s32.totalorder %s1171_s18, %s1167_s17 }
   0x9   : > { %s1245_s24 = scalar_select %p23_p0, %s1175_s19, %s25_s23  }
   0xa   : > { %p1247_p4 = por %p33_p2, %p32_p1  ;;  %p39_p5 = scmp.eq.s32.totalorder %s906_s3, 0 }
   0xb   : > { %p909_p7 = scmp.ge.s32.totalorder %s1179_s20, 2 }
   0xc   : > { %p1253_p6 = por %p39_p5, %p38_p3 }
   0xd   : > { %156 = sbr.rel (%p909_p7) target bundleno = 33 (0x21), region = 28 }
  0x14   : > { %s160_s27 = sand.u32 1, %s1175_s19   ;;  %s977_s29 = sshll.u32 %s1179_s20, 8 }
  0x15   : > { %s910_s28 = sshll.u32 %s160_s27, 5  ;;  %s170_s7 = scalar_lea.hbm %s1434_s0, %s977_s29 }
  0x16   : > { %s1034_s30 = scalar_select %p1247_p4, [#allocation0], [#allocation7] }
  0x17   : > { %s164_s9 = scalar_lea.vmem [#allocation3], %s910_s28  ;;  %s1181_s11 = smov 512  }
  0x18   : > { %s175_s8 = sld [smem:[%s1034_s30]]   ;;  %s183_s10 = sshll.u32 %s164_s9, 4  ;;  %s184_s10 = int_to_ptr.vmem [resolvable:$true] %s183_s10 }
  0x19   : > { %1035 = sst [smem:[#allocation6]] (%p1247_p4), %s1181_s11  ;;  %s1182_s12 = smov 256  }
  0x1a   : > { %1036 = sst [smem:[#allocation6 + $0x1]] (%p1247_p4), %s1182_s12  ;;  %s1183_s13 = smov 4  }
  0x1b   : > { %1037 = sst [smem:[#allocation6 + $0x2]] (%p1247_p4), %s1183_s13  ;;  %s1184_s14 = smov 64  }
  0x1c   : > { %1038 = sst [smem:[#allocation6 + $0x3]] (%p1247_p4), %s1184_s14  ;;  %s161_s17 = scalar_lea.sflag [#allocation4], %s160_s27 }
  0x1d   : > { %1039 = sst [smem:[#allocation6 + $0x4]] (%p1247_p4), %s1184_s14  ;;  %s1185_s22 = smov [#allocation5]  }
  0x1e   : > { %s913_s15 = sshll.u32 %s175_s8, 26  ;;  %1040 = sst [smem:[#allocation6 + $0x5]] (%p1247_p4), %s1183_s13 }
  0x1f   : > { %s914_s16 = sadd.s32 134217728, %s913_s15 }
  0x20   : > { %1041 = dma.general (%p1247_p4), %s170_s7, 512, %s184_s10, %s161_s17, %s1185_s22, [#allocation6], %s914_s16, 0  }
  0x21 PF: > { %p915_p8 = scmp.ge.s32.totalorder %s1179_s20, 1  ;;  %p204_p9 = scmp.lt.s32.totalorder %s1179_s20, 3 }
  0x23   : > { %p205_p10 = pnand %p915_p8, %p204_p9 }
  0x24   : > { %s210_s23 = sand.u32 (!%p205_p10), 1, %s1171_s18  }
  0x25   : > { %208 = sbr.rel (%p205_p10) target bundleno = 537 (0x219), region = 36  ;;  %s916_s28 = sshll.u32 (!%p205_p10), %s210_s23, 5 }
  0x26   : > { %s211_s29 = scalar_lea.sflag (!%p205_p10), [#allocation4], %s210_s23  ;;  %s1282_s30 = scalar_lea.vmem (!%p205_p10), [#allocation3], %s916_s28 }
  0x2c   : > { %1162 = dma.done.wait (%p1253_p6), %s211_s29, 512  }
  0x2d   : > { %1164 = vsyncadd (%p1253_p6), %s211_s29, 4294966784  ;;  %v1186_v0 = vmov 0   ;;  %v1081_v1 = vld [vmem:[%s1435_s1 + $0x4] ss:$8 sps:$4 sm:$0xff]   ;;  %v1083_v2 = vld [vmem:[%s1435_s1] ss:$8 sps:$4 sm:$0xff]  }
  0x2e   : > { %348 = vmatprep.mubr.bf16.mxu0 %v1186_v0  ;;  %458 = vmatprep.mubr.bf16.mxu1 %v1186_v0  ;;  %v1084_v3 = vld [vmem:[%s1435_s1 + $0x14] ss:$8 sps:$4 sm:$0xff]   ;;  %v1086_v4 = vld [vmem:[%s1435_s1 + $0x10] ss:$8 sps:$4 sm:$0xff]   ;;  %v1087_v5 = vld [vmem:[%s1435_s1 + $0x24] ss:$8 sps:$4 sm:$0xff]  }
  0x2f   : > { %316 = vmatprep.subr.bf16.mxu0 %v1081_v1  ;;  %426 = vmatprep.subr.bf16.mxu1 %v1081_v1  ;;  %v1089_v6 = vld [vmem:[%s1435_s1 + $0x20] ss:$8 sps:$4 sm:$0xff]   ;;  %v1090_v7 = vld [vmem:[%s1435_s1 + $0x34] ss:$8 sps:$4 sm:$0xff]   ;;  %v1092_v8 = vld [vmem:[%s1435_s1 + $0x30] ss:$8 sps:$4 sm:$0xff]  }
  0x30   : > { %317 = vmatpush1.bf16.msra.mxu0 %v1083_v2  ;;  %427 = vmatpush1.bf16.msra.mxu1 %v1083_v2  ;;  %v1097_v9 = vld [vmem:[%s1436_s2 + $0xc0] sm:$0xff]   ;;  %v1094_v12 = vld [vmem:[%s1282_s30 + $0x10] sm:$0xff]   ;;  %vm309_vm0 = vcmask 523264   ;;  %v1101_v15 = vld [vmem:[%s1436_s2 + $0xc8] sm:$0xff]   ;;  %s805_s28 = sld [smem:[#allocation2]]  ;;  %s917_s29 = sshll.u32 %s906_s3, 2 }
  0x31   : > { %318 = vmatprep.subr.bf16.mxu0 %v1084_v3  ;;  %428 = vmatprep.subr.bf16.mxu1 %v1084_v3  ;;  %v1093_v10 = vld [vmem:[%s1282_s30] sm:$0xff]   ;;  %v1102_v16 = vld [vmem:[%s1436_s2 + $0x48] sm:$0xff]   ;;  %v1096_v20 = vld [vmem:[%s1282_s30 + $0x18] sm:$0xff]   ;;  %p241_p11 = scmp.lt.s32.totalorder %s917_s29, 7 }
  0x32   : > { %v1098_v11 = vld [vmem:[%s1436_s2 + $0x40] sm:$0xff]   ;;  %v1103_v17 = vld [vmem:[%s1436_s2 + $0x88] sm:$0xff]   ;;  %v1105_v21 = vld [vmem:[%s1436_s2 + $0xd0] sm:$0xff]  }
  0x33   : > { %v1099_v13 = vld [vmem:[%s1436_s2 + $0x80] sm:$0xff]   ;;  %v1104_v18 = vld [vmem:[%s1436_s2 + $0x8] sm:$0xff]   ;;  %v1106_v22 = vld [vmem:[%s1436_s2 + $0x50] sm:$0xff]   ;;  %s1446_s29 = smov (!%p241_p11, %s917_s29), 7 }
  0x34   : > { %319 = vmatpush1.bf16.msra.mxu0 %v1086_v4  ;;  %429 = vmatpush1.bf16.msra.mxu1 %v1086_v4  ;;  %v1100_v14 = vld [vmem:[%s1436_s2] sm:$0xff]   ;;  %v1095_v19 = vld [vmem:[%s1282_s30 + $0x8] sm:$0xff]   ;;  %v1107_v23 = vld [vmem:[%s1436_s2 + $0x90] sm:$0xff]   ;;  %s918_s30 = sshll.u32 %s1446_s29, 3 }
  0x35   : > { %320 = vmatprep.subr.bf16.mxu0 %v1087_v5  ;;  %430 = vmatprep.subr.bf16.mxu1 %v1087_v5  ;;  %v1108_v24 = vld [vmem:[%s1436_s2 + $0x10] sm:$0xff]   ;;  %v1109_v25 = vld [vmem:[%s1436_s2 + $0xd8] sm:$0xff]   ;;  %v1113_v29 = vld [vmem:[%s1436_s2 + $0xe0] sm:$0xff]   ;;  %s244_s20 = scalar_lea.vmem %s1438_s4, %s918_s30 }
  0x36   : > { %v1110_v26 = vld [vmem:[%s1436_s2 + $0x58] sm:$0xff]   ;;  %v1114_v30 = vld [vmem:[%s1436_s2 + $0x60] sm:$0xff]   ;;  %v1117_v33 = vld [vmem:[%s1436_s2 + $0xe8] sm:$0xff]  }
  0x37   : > { %v1111_v27 = vld [vmem:[%s1436_s2 + $0x98] sm:$0xff]   ;;  %v1115_v31 = vld [vmem:[%s1436_s2 + $0xa0] sm:$0xff]   ;;  %v1118_v34 = vld [vmem:[%s1436_s2 + $0x68] sm:$0xff]  }
  0x38   : > { %321 = vmatpush1.bf16.msra.mxu0 %v1089_v6  ;;  %431 = vmatpush1.bf16.msra.mxu1 %v1089_v6  ;;  %v1112_v28 = vld [vmem:[%s1436_s2 + $0x18] sm:$0xff]   ;;  %v1116_v32 = vld [vmem:[%s1436_s2 + $0x20] sm:$0xff]   ;;  %v1119_v35 = vld [vmem:[%s1436_s2 + $0xa8] sm:$0xff]  }
  0x39   : > { %322 = vmatprep.subr.bf16.mxu0 %v1090_v7  ;;  %432 = vmatprep.subr.bf16.mxu1 %v1090_v7  ;;  %v1120_v36 = vld [vmem:[%s1436_s2 + $0x28] sm:$0xff]   ;;  %v1121_v37 = vld [vmem:[%s1436_s2 + $0xf0] sm:$0xff]   ;;  %v1125_v41 = vld [vmem:[%s1436_s2 + $0xf8] sm:$0xff]  }
  0x3a   : > { %v1122_v38 = vld [vmem:[%s1436_s2 + $0x70] sm:$0xff]   ;;  %v1126_v42 = vld [vmem:[%s1436_s2 + $0x78] sm:$0xff]  }
  0x3b   : > { %v1123_v39 = vld [vmem:[%s1436_s2 + $0xb0] sm:$0xff]   ;;  %v1127_v43 = vld [vmem:[%s1436_s2 + $0xb8] sm:$0xff]  }
  0x3c   : > { %323 = vmatpush1.bf16.msra.mxu0 %v1092_v8  ;;  %433 = vmatpush1.bf16.msra.mxu1 %v1092_v8  ;;  %v1124_v40 = vld [vmem:[%s1436_s2 + $0x30] sm:$0xff]   ;;  %v1128_v44 = vld [vmem:[%s1436_s2 + $0x38] sm:$0xff]  }
  0x3d   : > { %978 = vmatprep.subr.bf16.mxu0 %v1097_v9  ;;  %1006 = vmatprep.subr.bf16.mxu1 %v1098_v11 }
  0x3f   : > { %929 = vmatmul.mubr.msk.bf16.vlgmr.msra.gmra.mrb[0].mxu0 %vm309_vm0, %v1093_v10  ;;  %937 = vmatmul.mubr.msk.bf16.vlgmr.msra.gmra.mrb[0].mxu1 %vm309_vm0, %v1094_v12 }
  0x40   : > { %358 = vmatprep.mubr.bf16.mxu0 %v1186_v0  ;;  %468 = vmatprep.mubr.bf16.mxu1 %v1186_v0 }
  0x41   : > { %979 = vmatpush3.bf16.msra.mxu0 %v1099_v13  ;;  %1007 = vmatpush3.bf16.msra.mxu1 %v1100_v14  ;;  %v806_v13 = vstv %s805_s28 }
  0x42   : > { %980 = vmatprep.subr.bf16.mxu0 %v1101_v15  ;;  %1008 = vmatprep.subr.bf16.mxu1 %v1102_v16 }
  0x45   : > { %981 = vmatpush3.bf16.msra.mxu0 %v1103_v17  ;;  %1009 = vmatpush3.bf16.msra.mxu1 %v1104_v18 }
  0x46   : > { %982 = vmatprep.subr.bf16.mxu0 %v1105_v21  ;;  %1010 = vmatprep.subr.bf16.mxu1 %v1106_v22 }
  0x47   : > { %930 = vmatmul.mubr.msk.bf16.gmra.mrb[4].mxu0 %vm309_vm0, %v1095_v19  ;;  %938 = vmatmul.mubr.msk.bf16.gmra.mrb[4].mxu1 %vm309_vm0, %v1096_v20 }
  0x49   : > { %983 = vmatpush3.bf16.msra.mxu0 %v1107_v23  ;;  %1011 = vmatpush3.bf16.msra.mxu1 %v1108_v24 }
  0x4a   : > { %984 = vmatprep.subr.bf16.mxu0 %v1109_v25  ;;  %1012 = vmatprep.subr.bf16.mxu1 %v1110_v26 }
  0x4d   : > { %985 = vmatpush3.bf16.msra.mxu0 %v1111_v27  ;;  %1013 = vmatpush3.bf16.msra.mxu1 %v1112_v28 }
  0x4e   : > { %986 = vmatprep.subr.bf16.mxu0 %v1113_v29  ;;  %1014 = vmatprep.subr.bf16.mxu1 %v1114_v30 }
  0x51   : > { %987 = vmatpush3.bf16.msra.mxu0 %v1115_v31  ;;  %1015 = vmatpush3.bf16.msra.mxu1 %v1116_v32 }
  0x52   : > { %988 = vmatprep.subr.bf16.mxu0 %v1117_v33  ;;  %1016 = vmatprep.subr.bf16.mxu1 %v1118_v34 }
  0x55   : > { %989 = vmatpush3.bf16.msra.mxu0 %v1119_v35  ;;  %1017 = vmatpush3.bf16.msra.mxu1 %v1120_v36 }
  0x56   : > { %990 = vmatprep.subr.bf16.mxu0 %v1121_v37  ;;  %1018 = vmatprep.subr.bf16.mxu1 %v1122_v38 }
  0x59   : > { %991 = vmatpush3.bf16.msra.mxu0 %v1123_v39  ;;  %1019 = vmatpush3.bf16.msra.mxu1 %v1124_v40 }
  0x5a   : > { %992 = vmatprep.subr.bf16.mxu0 %v1125_v41  ;;  %1020 = vmatprep.subr.bf16.mxu1 %v1126_v42 }
  0x5d   : > { %993 = vmatpush3.bf16.msra.mxu0 %v1127_v43  ;;  %1021 = vmatpush3.bf16.msra.mxu1 %v1128_v44 }
 0x112   : > { %v350_v45 = vpop.f32.mrb[0].mxu0  ;;  %v460_v46 = vpop.f32.mrb[0].mxu1 }
 0x113   : > { %v352_v47 = vpop.f32.mrb[1].mxu0  ;;  %v462_v48 = vpop.f32.mrb[1].mxu1 }
 0x114   : > { %v354_v49 = vpop.f32.mrb[2].mxu0  ;;  %v464_v50 = vpop.f32.mrb[2].mxu1 }
 0x115   : > { %v369_v51 = vpack.c.bf16 %v354_v49, %v350_v45  ;;  %v479_v52 = vpack.c.bf16 %v464_v50, %v460_v46  ;;  %v356_v53 = vpop.f32.mrb[3].mxu0  ;;  %v466_v54 = vpop.f32.mrb[3].mxu1 }
 0x116   : > { %v370_v55 = vpack.c.bf16 %v356_v53, %v352_v47  ;;  %v480_v56 = vpack.c.bf16 %v466_v54, %v462_v48 }
 0x118   : > { %643 = vmatprep.mubr.bf16.mxu0 %v480_v56  ;;  %788 = vmatprep.mubr.bf16.mxu1 %v370_v55 }
 0x119   : > { %644 = vmatmul.mubr.bf16.vlgmr.msra.gmra.mrb[8].mxu0 %v479_v52  ;;  %789 = vmatmul.mubr.bf16.vlgmr.msra.gmra.mrb[8].mxu1 %v369_v51 }
 0x11a   : > { %v360_v57 = vpop.f32.mrb[4].mxu0  ;;  %v470_v58 = vpop.f32.mrb[4].mxu1 }
 0x11b   : > { %v362_v59 = vpop.f32.mrb[5].mxu0  ;;  %v472_v60 = vpop.f32.mrb[5].mxu1 }
 0x11c   : > { %v364_v61 = vpop.f32.mrb[6].mxu0  ;;  %v474_v62 = vpop.f32.mrb[6].mxu1 }
 0x11d   : > { %v371_v63 = vpack.c.bf16 %v364_v61, %v360_v57  ;;  %v481_v0 = vpack.c.bf16 %v474_v62, %v470_v58  ;;  %v366_v1 = vpop.f32.mrb[7].mxu0  ;;  %v476_v2 = vpop.f32.mrb[7].mxu1 }
 0x11e   : > { %v372_v3 = vpack.c.bf16 %v366_v1, %v362_v59  ;;  %v482_v4 = vpack.c.bf16 %v476_v2, %v472_v60 }
 0x120   : > { %651 = vmatprep.mubr.bf16.mxu0 %v482_v4  ;;  %796 = vmatprep.mubr.bf16.mxu1 %v372_v3 }
 0x121   : > { %652 = vmatmul.mubr.bf16.gmra.mrb[12].mxu0 %v481_v0  ;;  %797 = vmatmul.mubr.bf16.gmra.mrb[12].mxu1 %v371_v63 }
 0x1ec   : > { %v994_v5 = vpop.f32.mrb[8].mxu0  ;;  %v1022_v6 = vpop.f32.mrb[8].mxu1 }
 0x1ed   : > { %v995_v7 = vpop.f32.mrb[9].mxu0  ;;  %v1023_v8 = vpop.f32.mrb[9].mxu1 }
 0x1ee   : > { %v996_v9 = vadd.f32 %v995_v7, %v994_v5  ;;  %v1024_v10 = vadd.f32 %v1023_v8, %v1022_v6  ;;  %v997_v11 = vpop.f32.mrb[10].mxu0  ;;  %v1025_v12 = vpop.f32.mrb[10].mxu1 }
 0x1ef   : > { %v998_v14 = vpop.f32.mrb[11].mxu0  ;;  %v1026_v15 = vpop.f32.mrb[11].mxu1 }
 0x1f0   : > { %v791_v16 = vadd.f32 %v1024_v10, %v996_v9  ;;  %v999_v17 = vadd.f32 %v998_v14, %v997_v11  ;;  %v1027_v18 = vadd.f32 %v1026_v15, %v1025_v12 }
 0x1f2   : > { %v807_v19 = vadd.f32 %v806_v13, %v791_v16  ;;  %v794_v20 = vadd.f32 %v1027_v18, %v999_v17 }
 0x1f4   : > { %v971_v21 = vmul.f32 -1.442695, %v807_v19  ;;  %v808_v22 = vadd.f32 %v806_v13, %v794_v20  ;;  %v1000_v23 = vpop.f32.mrb[12].mxu0  ;;  %v1028_v24 = vpop.f32.mrb[12].mxu1 }
 0x1f5   : > { %v1001_v25 = vpop.f32.mrb[13].mxu0  ;;  %v1029_v26 = vpop.f32.mrb[13].mxu1 }
 0x1f6   : > { %1129 = vpow2.f32 %v971_v21  ;;  %v972_v27 = vmul.f32 -1.442695, %v808_v22  ;;  %v1002_v28 = vadd.f32 %v1001_v25, %v1000_v23  ;;  %v1030_v29 = vadd.f32 %v1029_v26, %v1028_v24  ;;  %v1003_v30 = vpop.f32.mrb[14].mxu0  ;;  %v1031_v31 = vpop.f32.mrb[14].mxu1 }
 0x1f7   : > { %v1004_v32 = vpop.f32.mrb[15].mxu0  ;;  %v1032_v33 = vpop.f32.mrb[15].mxu1 }
 0x1f8   : > { %1131 = vpow2.f32 %v972_v27  ;;  %v799_v34 = vadd.f32 %v1030_v29, %v1002_v28  ;;  %v1005_v35 = vadd.f32 %v1004_v32, %v1003_v30  ;;  %v1033_v36 = vadd.f32 %v1032_v33, %v1031_v31 }
 0x1fa   : > { %v809_v37 = vadd.f32 %v806_v13, %v799_v34  ;;  %v802_v38 = vadd.f32 %v1033_v36, %v1005_v35 }
 0x1fc   : > { %v973_v39 = vmul.f32 -1.442695, %v809_v37  ;;  %v810_v40 = vadd.f32 %v806_v13, %v802_v38 }
 0x1fe   : > { %1133 = vpow2.f32 %v973_v39  ;;  %v974_v41 = vmul.f32 -1.442695, %v810_v40 }
 0x200   : > { %v1130_v42 = vpop.eup %1129  ;;  %1135 = vpow2.f32 %v974_v41 }
 0x201   : > { %v823_v43 = vadd.f32 1.0, %v1130_v42 }
 0x202   : > { %v1132_v44 = vpop.eup %1131 }
 0x203   : > { %1137 = vrcp.f32 %v823_v43  ;;  %v824_v45 = vadd.f32 1.0, %v1132_v44 }
 0x205   : > { %1139 = vrcp.f32 %v824_v45 }
 0x208   : > { %v1134_v46 = vpop.eup %1133 }
 0x209   : > { %v825_v47 = vadd.f32 1.0, %v1134_v46 }
 0x20a   : > { %v1136_v48 = vpop.eup %1135 }
 0x20b   : > { %1141 = vrcp.f32 %v825_v47  ;;  %v826_v49 = vadd.f32 1.0, %v1136_v48 }
 0x20d   : > { %v1138_v50 = vpop.eup %1137  ;;  %1143 = vrcp.f32 %v826_v49 }
 0x20e   : > { %835 = vst [vmem:[%s244_s20] sm:$0xff] %v1138_v50 }
 0x20f   : > { %v1140_v51 = vpop.eup %1139 }
 0x210   : > { %836 = vst [vmem:[%s244_s20 + $0x8] sm:$0xff] %v1140_v51 }
 0x215   : > { %v1142_v52 = vpop.eup %1141 }
 0x216   : > { %837 = vst [vmem:[%s244_s20 + $0x10] sm:$0xff] %v1142_v52 }
 0x217   : > { %v1144_v53 = vpop.eup %1143 }
 0x218   : > { %838 = vst [vmem:[%s244_s20 + $0x18] sm:$0xff] %v1144_v53 }
 0x219 PF: > { %p15_p12 = scmp.ge.s32.totalorder %s1235_s21, 4   ;;  %s1441_s17 = smov %s1171_s18 }
 0x21a   : > { %s1442_s18 = smov %s1175_s19  ;;  %s1443_s19 = smov %s1245_s24 }
 0x21b   : > { %s1444_s20 = smov %s1235_s21  ;;  %17 = sbr.rel (!%p15_p12) target bundleno = 5 (0x5), region = 82 }
 0x222   :  { %861 = vsyncpa [#allocation4], 1 }
 0x223   :  { %863 = vsyncpa [#allocation4 + $0x1], 1 }

</bundles_post_ra>
